<compile_context>
chip_gen: v7x
topology: tpu7x:2x2x1
jax: 0.10.0
libtpu: 0.0.40
codegen_flags: <defaults>
</compile_context>

<pallas_src>
import functools

import jax
import jax.numpy as jnp
from jax.experimental import pallas as pl
from jax.experimental.pallas import tpu as pltpu

N_TIME_INTERVAL = 1000   # self.n_time_interval
OUTPUT_DIM = 8           # self.output_dim
_LANE = 128
_MAX_TILE_M = 512        # rows (lanes) per grid step; multiple of 128


def _cdiv(a, b):
    return (a + b - 1) // b


def _slide_time_kernel(ts_ref, wt_ref, b_ref, out_ref, *,
                       min_time, inv_per_time, k_pad):
    # ts_ref : (1, TM)      f32  lane-dense timestamps
    # wt_ref : (8, K_pad)   f32  lane-dense weight (columns >= 1000 are zero)
    # b_ref  : (8, 1)       f32  bias
    # out_ref: (8, TM)      f32  transposed, lane-dense output
    ts = ts_ref[...]
    # pass_time = floor((timestamp - min_time) / per_time); ReLU clamps to >= 0.
    idx = jnp.floor((ts - min_time) * inv_per_time).astype(jnp.int32)
    idx = jnp.maximum(idx, 0)                                      # (1, TM)

    tm = out_ref.shape[1]
    # one_hot^T[k, i] = (idx_i == k); idx >= k_pad matches nothing -> bias-only
    # row, same as the jax.nn.one_hot reference (OOB -> all-zero one-hot).
    row = jax.lax.broadcasted_iota(jnp.int32, (k_pad, tm), 0)
    one_hot_t = (row == idx).astype(jnp.float32)                   # (K_pad, TM)

    # (8, K_pad) @ (K_pad, TM) -> (8, TM); lane-dense output store.
    out_ref[...] = (jnp.dot(wt_ref[...], one_hot_t,
                            preferred_element_type=jnp.float32)
                    + b_ref[...])


@functools.partial(jax.jit,
                   static_argnames=("min_time", "pass_time", "n_time_interval"))
def slide_time_encoder(inp, timestamp, weight, bias, min_time, pass_time,
                       n_time_interval=N_TIME_INTERVAL):
    """Pallas implementation of SlideTimeEncoder.forward.

    inp:       (B, L)      -- only the shape is used (as in the PyTorch module)
    timestamp: (B, L + 1)  -- float seconds
    weight:    (8, 1000)   -- nn.Linear weight
    bias:      (8,)        -- nn.Linear bias
    Returns (time_embedding (B, L, 8) f32, timestamp[:, :-1]).
    """
    B, L = inp.shape
    N = B * L
    inv_per_time = float(n_time_interval) / float(pass_time)       # 1 / per_time

    # Row tiling: bounded lane-dense tile, pad N up to a whole number of tiles.
    tile_m = min(_MAX_TILE_M, _LANE * _cdiv(N, _LANE))
    n_pad = tile_m * _cdiv(N, tile_m)
    k_pad = _LANE * _cdiv(n_time_interval, _LANE)                  # 1000 -> 1024

    ts_trunc = timestamp[:, :-1]                                    # (B, L)
    ts_flat = ts_trunc.reshape(N).astype(jnp.float32)
    # Pad rows with min_time (bucket 0); padded columns are dropped below.
    ts_padded = jnp.pad(ts_flat, (0, n_pad - N),
                        constant_values=float(min_time)).reshape(1, n_pad)

    # Lane-dense weight (8, K_pad), zero-padded extra columns; bias as (8, 1).
    wt = jnp.asarray(weight, jnp.float32)                           # (8, 1000)
    wt_pad = jnp.pad(wt, ((0, 0), (0, k_pad - n_time_interval)))    # (8, 1024)
    b2 = jnp.asarray(bias, jnp.float32).reshape(OUTPUT_DIM, 1)      # (8, 1)

    kernel = functools.partial(_slide_time_kernel,
                               min_time=float(min_time),
                               inv_per_time=inv_per_time,
                               k_pad=k_pad)

    out_t = pl.pallas_call(
        kernel,
        out_shape=jax.ShapeDtypeStruct((OUTPUT_DIM, n_pad), jnp.float32),
        grid_spec=pltpu.PrefetchScalarGridSpec(
            num_scalar_prefetch=0,
            grid=(n_pad // tile_m,),
            in_specs=[
                pl.BlockSpec((1, tile_m), lambda i: (0, i)),
                pl.BlockSpec((OUTPUT_DIM, k_pad), lambda i: (0, 0)),
                pl.BlockSpec((OUTPUT_DIM, 1), lambda i: (0, 0)),
            ],
            out_specs=pl.BlockSpec((OUTPUT_DIM, tile_m), lambda i: (0, i)),
        ),
        compiler_params=pltpu.CompilerParams(
            dimension_semantics=("parallel",)),   # shards row tiles across v7x's 2 TCs
    )(ts_padded, wt_pad, b2)

    # Un-transpose / un-pad in the (jit-fused) wrapper.
    emb = out_t[:, :N].T.reshape(B, L, OUTPUT_DIM)
    return emb, ts_trunc


def _reference(inp, timestamp, weight, bias, min_time, pass_time,
               n_time_interval=N_TIME_INTERVAL):
    # Pure-JAX reference of the PyTorch forward (for a correctness check).
    # Uses the same f32 multiply-by-inverse bucketing as the kernel so bucket
    # boundaries match exactly.
    B, L = inp.shape
    inv_per_time = float(n_time_interval) / float(pass_time)
    ts = timestamp[:, :-1]
    idx = jnp.maximum(
        jnp.floor((ts.astype(jnp.float32) - min_time) * inv_per_time)
        .astype(jnp.int32), 0)
    one_hot = jax.nn.one_hot(idx.reshape(B * L), n_time_interval,
                             dtype=jnp.float32)
    emb = one_hot @ jnp.asarray(weight, jnp.float32).T + jnp.asarray(bias, jnp.float32)
    return emb.reshape(B, L, OUTPUT_DIM), ts


if __name__ == "__main__":
    key = jax.random.PRNGKey(0)
    k_w, k_b, k_ts, k_in = jax.random.split(key, 4)

    B, L = 2, 8                                   # batch=2, seq(max_len)=8
    min_time = 0.0
    pass_time = 1000.0                            # from GetPasstime (synthetic)

    # Deterministic parameter init (xavier_normal_ for weight, small uniform bias).
    fan_in, fan_out = N_TIME_INTERVAL, OUTPUT_DIM
    xavier_std = (2.0 / (fan_in + fan_out)) ** 0.5
    weight = xavier_std * jax.random.normal(k_w, (OUTPUT_DIM, N_TIME_INTERVAL),
                                            jnp.float32)
    bound = 1.0 / (fan_in ** 0.5)
    bias = jax.random.uniform(k_b, (OUTPUT_DIM,), jnp.float32, -bound, bound)

    # Synthetic inputs consistent with the module's forward signature.
    inp = jax.random.randint(k_in, (B, L), 0, 100)                   # (B, max_len)
    timestamp = jax.random.uniform(k_ts, (B, L + 1), jnp.float32,
                                   min_time, min_time + pass_time)   # (B, max_len+1)

    emb, ts_out = slide_time_encoder(inp, timestamp, weight, bias,
                                     min_time, pass_time)
    jax.block_until_ready(emb)
    jax.block_until_ready(ts_out)

    emb_ref, ts_ref = _reference(inp, timestamp, weight, bias, min_time, pass_time)
    assert emb.shape == (B, L, OUTPUT_DIM) and emb.dtype == jnp.float32
    assert jnp.allclose(emb, emb_ref, atol=1e-5, rtol=1e-5)
    assert jnp.array_equal(ts_out, ts_ref)

    print("KERNEL_OK")
</pallas_src>

<mosaic_0001>
module attributes {stable_mosaic.version = 11 : i64} {
  func.func @_slide_time_kernel(%arg0: i32, %arg1: memref<1x128xf32, #tpu.memory_space<vmem>>, %arg2: memref<8x1024xf32, #tpu.memory_space<vmem>>, %arg3: memref<8x1xf32, #tpu.memory_space<vmem>>, %arg4: memref<8x128xf32, #tpu.memory_space<vmem>>) attributes {dimension_semantics = [#tpu.dimension_semantics<parallel>], iteration_bounds = array<i64: 1>, scalar_prefetch = 0 : i64, scratch_operands = 0 : i64, tpu.core_type = #tpu.core_type<tc>, window_params = [{transform_indices = @transform_0, window_bounds = array<i64: 1, 128>}, {pipeline_mode = #tpu.pipeline_mode<synchronous>, transform_indices = @transform_1, window_bounds = array<i64: 8, 1024>}, {pipeline_mode = #tpu.pipeline_mode<synchronous>, transform_indices = @transform_2, window_bounds = array<i64: 8, 1>}, {transform_indices = @transform_3, window_bounds = array<i64: 8, 128>}]} {
    %c0 = arith.constant 0 : index
    %c0_0 = arith.constant 0 : index
    %0 = vector.load %arg1[%c0, %c0_0] : memref<1x128xf32, #tpu.memory_space<vmem>>, vector<1x128xf32>
    %cst = arith.constant 0.000000e+00 : f32
    %1 = vector.broadcast %cst : f32 to vector<1x128xf32>
    %2 = arith.subf %0, %1 : vector<1x128xf32>
    %cst_1 = arith.constant 1.000000e+00 : f32
    %3 = vector.broadcast %cst_1 : f32 to vector<1x128xf32>
    %4 = arith.mulf %2, %3 : vector<1x128xf32>
    %5 = math.floor %4 : vector<1x128xf32>
    %6 = arith.fptosi %5 : vector<1x128xf32> to vector<1x128xi32>
    %c0_i32 = arith.constant 0 : i32
    %7 = vector.broadcast %c0_i32 : i32 to vector<1x128xi32>
    %8 = arith.maxsi %6, %7 : vector<1x128xi32>
    %9 = tpu.iota {dimensions = array<i32: 0>} : vector<1024x128xi32>
    %10 = vector.broadcast %8 : vector<1x128xi32> to vector<1024x128xi32>
    %11 = arith.cmpi eq, %9, %10 : vector<1024x128xi32>
    %12 = arith.extui %11 : vector<1024x128xi1> to vector<1024x128xi32>
    %13 = arith.sitofp %12 : vector<1024x128xi32> to vector<1024x128xf32>
    %c0_2 = arith.constant 0 : index
    %c0_3 = arith.constant 0 : index
    %14 = vector.load %arg2[%c0_2, %c0_3] : memref<8x1024xf32, #tpu.memory_space<vmem>>, vector<8x1024xf32>
    %cst_4 = arith.constant dense<0.000000e+00> : vector<8x128xf32>
    %15 = tpu.matmul %14, %13, %cst_4 {dimension_numbers = #tpu.dot_dimension_numbers<[1], [0], [0], [1], [0, 0, 1, 1], [], []>} : vector<8x1024xf32>, vector<1024x128xf32>, vector<8x128xf32> -> vector<8x128xf32>
    %c0_5 = arith.constant 0 : index
    %c0_6 = arith.constant 0 : index
    %16 = vector.load %arg3[%c0_5, %c0_6] : memref<8x1xf32, #tpu.memory_space<vmem>>, vector<8x1xf32>
    %17 = vector.broadcast %16 : vector<8x1xf32> to vector<8x128xf32>
    %18 = arith.addf %15, %17 : vector<8x128xf32>
    %c0_7 = arith.constant 0 : index
    %c0_8 = arith.constant 0 : index
    %19 = vector.load %arg4[%c0_7, %c0_8] : memref<8x128xf32, #tpu.memory_space<vmem>>, vector<8x128xf32>
    tpu.vector_store %arg4[%c0_7, %c0_8], %18 {strides = array<i32>} : memref<8x128xf32, #tpu.memory_space<vmem>>, vector<8x128xf32>,
    return
  }
  func.func @transform_0(%arg0: i32) -> (i32, i32) {
    %c0_i32 = arith.constant 0 : i32
    %c0_i32_0 = arith.constant 0 : i32
    return %c0_i32, %arg0 : i32, i32
  }
  func.func @transform_1(%arg0: i32) -> (i32, i32) {
    %c0_i32 = arith.constant 0 : i32
    %c0_i32_0 = arith.constant 0 : i32
    %c0_i32_1 = arith.constant 0 : i32
    return %c0_i32, %c0_i32_0 : i32, i32
  }
  func.func @transform_2(%arg0: i32) -> (i32, i32) {
    %c0_i32 = arith.constant 0 : i32
    %c0_i32_0 = arith.constant 0 : i32
    %c0_i32_1 = arith.constant 0 : i32
    return %c0_i32, %c0_i32_0 : i32, i32
  }
  func.func @transform_3(%arg0: i32) -> (i32, i32) {
    %c0_i32 = arith.constant 0 : i32
    %c0_i32_0 = arith.constant 0 : i32
    return %c0_i32, %arg0 : i32, i32
  }
}

</mosaic_0001>

<bundles_post_ra>
// kernel: slide_time_encoder.1
= control target key start
LH: loop header
LB: loop body
LE: loop exit
PB: predicated region body
PF: predicated region fallthrough
CT: control target
= control target key end

     0   :  { %v19_v0 = vlaneseq  ;;  %v1364_v3 = vmov 0   ;;  %v1365_v31 = vmov 1.0|1.0   ;;  %s1970_s0 = inlined_call_operand.vmem [shape: f32[1,128], index: 0, kind: input, shape index: {}]   ;;  %s1971_s1 = inlined_call_operand.vmem [shape: f32[8,1024], index: 1, kind: input, shape index: {}]   ;;  %s1972_s2 = inlined_call_operand.vmem [shape: f32[8,1], index: 2, kind: input, shape index: {}]   ;;  %s1973_s3 = inlined_call_operand.vmem [shape: f32[8,128], index: 3, kind: output, shape index: {}]  }
   0x1   :  { %v14_v1 = vld [vmem:[%s1970_s0] sm:$0x1]  ;;  %v537_v2 = vld [vmem:[%s1971_s1 + $0x8] sm:$0xff]  ;;  %1363 = vset.pattern.permute.xlu0 %v1364_v3  ;;  %v539_v6 = vld [vmem:[%s1971_s1 + $0x18] sm:$0xff] }
   0x2   :  { %v15_v4 = vfloor.f32 %v14_v1  ;;  %v1392_v5 = vshrl.u32 %v19_v0, 7  ;;  %614 = vmatprep.mubr.f32.mxu0 %v537_v2  ;;  %684 = vmatprep.mubr.f32.mxu1 %v539_v6  ;;  %v544_v8 = vld [vmem:[%s1972_s2] sm:$0xff] }
   0x3   :  { %547 = vperm.xlu0 %1363, %v544_v8  }
   0x4   :  { %v1359_v7 = vtrunc.f32 %v15_v4  ;;  %v36_v10 = vadd.s32 128, %v1392_v5  ;;  %v150_v11 = vsub.s32 0, %v1392_v5  ;;  %v37_v12 = vadd.s32 136, %v1392_v5 }
   0x5   :  { %v21_v13 = vadd.s32 8, %v1392_v5  ;;  %v68_v14 = vadd.s32 384, %v1392_v5  ;;  %v69_v15 = vadd.s32 392, %v1392_v5  ;;  %v52_v16 = vadd.s32 256, %v1392_v5 }
   0x6   :  { %v1360_v9 = vcvt.f32.s32 %v1359_v7  ;;  %v53_v17 = vadd.s32 264, %v1392_v5  ;;  %v38_v18 = vadd.s32 144, %v1392_v5  ;;  %v39_v20 = vadd.s32 152, %v1392_v5 }
   0x7   :  { %v22_v21 = vadd.s32 16, %v1392_v5  ;;  %v23_v22 = vadd.s32 24, %v1392_v5  ;;  %v70_v24 = vadd.s32 400, %v1392_v5  ;;  %v71_v25 = vadd.s32 408, %v1392_v5 }
   0x8   :  { %vm17_vm0 = vcmp.gt.s32.totalorder %v1360_v9, 0  ;;  %v54_v26 = vadd.s32 272, %v1392_v5  ;;  %v55_v27 = vadd.s32 280, %v1392_v5  ;;  %v40_v28 = vadd.s32 160, %v1392_v5 }
   0x9   :  { %v18_v19 = vsel %vm17_vm0, %v1360_v9, 0  ;;  %v41_v29 = vadd.s32 168, %v1392_v5  ;;  %v24_v30 = vadd.s32 32, %v1392_v5  ;;  %v25_v32 = vadd.s32 40, %v1392_v5 }
   0xa   :  { %v1412_v23 = vrot.slane %v18_v19, %v150_v11  ;;  %v72_v33 = vadd.s32 416, %v1392_v5  ;;  %v73_v34 = vadd.s32 424, %v1392_v5  ;;  %v56_v35 = vadd.s32 288, %v1392_v5 }
   0xb   :  { %v57_v36 = vadd.s32 296, %v1392_v5  ;;  %v42_v37 = vadd.s32 176, %v1392_v5  ;;  %v43_v38 = vadd.s32 184, %v1392_v5  ;;  %v26_v39 = vadd.s32 48, %v1392_v5 }
   0xc   :  { %vm168_vm1 = vcmp.eq.s32.totalorder %v36_v10, %v1412_v23  ;;  %vm169_vm2 = vcmp.eq.s32.totalorder %v37_v12, %v1412_v23  ;;  %vm152_vm3 = vcmp.eq.s32.totalorder %v1392_v5, %v1412_v23  ;;  %vm153_vm4 = vcmp.eq.s32.totalorder %v21_v13, %v1412_v23 }
   0xd   :  { %vm1231_vm5 = vmpackc.low %vm169_vm2, %vm168_vm1  ;;  %vm200_vm6 = vcmp.eq.s32.totalorder %v68_v14, %v1412_v23  ;;  %vm201_vm7 = vcmp.eq.s32.totalorder %v69_v15, %v1412_v23  ;;  %vm184_vm8 = vcmp.eq.s32.totalorder %v52_v16, %v1412_v23  ;;  %vm185_vm9 = vcmp.eq.s32.totalorder %v53_v17, %v1412_v23 }
   0xe   :  { %1232 = vmatprep.subr.msk.bf16.mxu0 %vm1231_vm5, %v1365_v31  ;;  %vm1233_vm10 = vmpackc.low %vm153_vm4, %vm152_vm3  ;;  %vm170_vm11 = vcmp.eq.s32.totalorder %v38_v18, %v1412_v23  ;;  %vm171_vm12 = vcmp.eq.s32.totalorder %v39_v20, %v1412_v23  ;;  %vm154_vm14 = vcmp.eq.s32.totalorder %v22_v21, %v1412_v23  ;;  %vm155_vm15 = vcmp.eq.s32.totalorder %v23_v22, %v1412_v23 }
   0xf   :  { %1234 = vmatpush3.bf16.msk.msra.mxu0 %vm1233_vm10, %v1365_v31  ;;  %vm1263_vm13 = vmpackc.low %vm201_vm7, %vm200_vm6  ;;  %vm202_vm1 = vcmp.eq.s32.totalorder %v70_v24, %v1412_v23  ;;  %vm203_vm2 = vcmp.eq.s32.totalorder %v71_v25, %v1412_v23  ;;  %vm186_vm4 = vcmp.eq.s32.totalorder %v54_v26, %v1412_v23  ;;  %vm187_vm5 = vcmp.eq.s32.totalorder %v55_v27, %v1412_v23  ;;  %v536_v26 = vld [vmem:[%s1971_s1] sm:$0xff] }
  0x10   :  { %1264 = vmatprep.subr.msk.bf16.mxu1 %vm1263_vm13, %v1365_v31  ;;  %vm1265_vm0 = vmpackc.low %vm185_vm9, %vm184_vm8  ;;  %vm172_vm7 = vcmp.eq.s32.totalorder %v40_v28, %v1412_v23  ;;  %vm173_vm8 = vcmp.eq.s32.totalorder %v41_v29, %v1412_v23  ;;  %vm156_vm9 = vcmp.eq.s32.totalorder %v24_v30, %v1412_v23  ;;  %vm157_vm10 = vcmp.eq.s32.totalorder %v25_v32, %v1412_v23 }
  0x11   :  { %1266 = vmatpush3.bf16.msk.msra.mxu1 %vm1265_vm0, %v1365_v31  ;;  %vm1235_vm3 = vmpackc.low %vm171_vm12, %vm170_vm11  ;;  %vm204_vm12 = vcmp.eq.s32.totalorder %v72_v33, %v1412_v23  ;;  %v27_v40 = vadd.s32 56, %v1392_v5  ;;  %v74_v41 = vadd.s32 432, %v1392_v5  ;;  %v75_v42 = vadd.s32 440, %v1392_v5  ;;  %v541_v33 = vld [vmem:[%s1971_s1 + $0x28] sm:$0xff] }
  0x12   :  { %1236 = vmatprep.subr.msk.bf16.mxu0 %vm1235_vm3, %v1365_v31  ;;  %vm1237_vm6 = vmpackc.low %vm155_vm15, %vm154_vm14  ;;  %vm205_vm14 = vcmp.eq.s32.totalorder %v73_v34, %v1412_v23  ;;  %vm188_vm15 = vcmp.eq.s32.totalorder %v56_v35, %v1412_v23  ;;  %v58_v43 = vadd.s32 304, %v1392_v5  ;;  %v59_v44 = vadd.s32 312, %v1392_v5  ;;  %v538_v34 = vld [vmem:[%s1971_s1 + $0x10] sm:$0xff] }
  0x13   :  { %1238 = vmatpush3.bf16.msk.msra.mxu0 %vm1237_vm6, %v1365_v31  ;;  %vm1267_vm11 = vmpackc.low %vm203_vm2, %vm202_vm1  ;;  %vm189_vm1 = vcmp.eq.s32.totalorder %v57_v36, %v1412_v23  ;;  %vm174_vm2 = vcmp.eq.s32.totalorder %v42_v37, %v1412_v23  ;;  %v44_v45 = vadd.s32 192, %v1392_v5  ;;  %v45_v46 = vadd.s32 200, %v1392_v5 }
  0x14   :  { %1268 = vmatprep.subr.msk.bf16.mxu1 %vm1267_vm11, %v1365_v31  ;;  %vm1269_vm13 = vmpackc.low %vm187_vm5, %vm186_vm4  ;;  %vm175_vm4 = vcmp.eq.s32.totalorder %v43_v38, %v1412_v23  ;;  %vm158_vm5 = vcmp.eq.s32.totalorder %v26_v39, %v1412_v23  ;;  %v28_v47 = vadd.s32 64, %v1392_v5  ;;  %v29_v48 = vadd.s32 72, %v1392_v5  ;;  %v543_v39 = vld [vmem:[%s1971_s1 + $0x38] sm:$0xff] }
  0x15   :  { %1270 = vmatpush3.bf16.msk.msra.mxu1 %vm1269_vm13, %v1365_v31  ;;  %vm1239_vm0 = vmpackc.low %vm173_vm8, %vm172_vm7  ;;  %vm159_vm7 = vcmp.eq.s32.totalorder %v27_v40, %v1412_v23  ;;  %vm206_vm8 = vcmp.eq.s32.totalorder %v74_v41, %v1412_v23  ;;  %v76_v49 = vadd.s32 448, %v1392_v5  ;;  %vm190_vm11 = vcmp.eq.s32.totalorder %v58_v43, %v1412_v23 }
  0x16   :  { %1240 = vmatprep.subr.msk.bf16.mxu0 %vm1239_vm0, %v1365_v31  ;;  %vm1241_vm3 = vmpackc.low %vm157_vm10, %vm156_vm9  ;;  %vm207_vm9 = vcmp.eq.s32.totalorder %v75_v42, %v1412_v23  ;;  %vm191_vm13 = vcmp.eq.s32.totalorder %v59_v44, %v1412_v23  ;;  %v77_v50 = vadd.s32 456, %v1392_v5  ;;  %v60_v51 = vadd.s32 320, %v1392_v5 }
  0x17   :  { %1242 = vmatpush3.bf16.msk.msra.mxu0 %vm1241_vm3, %v1365_v31  ;;  %vm1271_vm6 = vmpackc.low %vm205_vm14, %vm204_vm12  ;;  %vm176_vm14 = vcmp.eq.s32.totalorder %v44_v45, %v1412_v23  ;;  %vm177_vm0 = vcmp.eq.s32.totalorder %v45_v46, %v1412_v23  ;;  %v61_v52 = vadd.s32 328, %v1392_v5  ;;  %v46_v53 = vadd.s32 208, %v1392_v5 }
  0x18   :  { %1272 = vmatprep.subr.msk.bf16.mxu1 %vm1271_vm6, %v1365_v31  ;;  %vm1273_vm10 = vmpackc.low %vm189_vm1, %vm188_vm15  ;;  %vm160_vm1 = vcmp.eq.s32.totalorder %v28_v47, %v1412_v23  ;;  %vm161_vm3 = vcmp.eq.s32.totalorder %v29_v48, %v1412_v23  ;;  %v47_v54 = vadd.s32 216, %v1392_v5  ;;  %v30_v55 = vadd.s32 80, %v1392_v5 }
  0x19   :  { %1274 = vmatpush3.bf16.msk.msra.mxu1 %vm1273_vm10, %v1365_v31  ;;  %vm1243_vm12 = vmpackc.low %vm175_vm4, %vm174_vm2  ;;  %vm208_vm4 = vcmp.eq.s32.totalorder %v76_v49, %v1412_v23  ;;  %v31_v56 = vadd.s32 88, %v1392_v5  ;;  %v78_v57 = vadd.s32 464, %v1392_v5  ;;  %v79_v58 = vadd.s32 472, %v1392_v5 }
  0x1a   :  { %1244 = vmatprep.subr.msk.bf16.mxu0 %vm1243_vm12, %v1365_v31  ;;  %vm1245_vm15 = vmpackc.low %vm159_vm7, %vm158_vm5  ;;  %vm209_vm6 = vcmp.eq.s32.totalorder %v77_v50, %v1412_v23  ;;  %vm192_vm7 = vcmp.eq.s32.totalorder %v60_v51, %v1412_v23  ;;  %v62_v59 = vadd.s32 336, %v1392_v5  ;;  %v63_v60 = vadd.s32 344, %v1392_v5 }
  0x1b   :  { %1246 = vmatpush3.bf16.msk.msra.mxu0 %vm1245_vm15, %v1365_v31  ;;  %vm1275_vm2 = vmpackc.low %vm207_vm9, %vm206_vm8  ;;  %vm193_vm9 = vcmp.eq.s32.totalorder %v61_v52, %v1412_v23  ;;  %vm178_vm10 = vcmp.eq.s32.totalorder %v46_v53, %v1412_v23  ;;  %v48_v61 = vadd.s32 224, %v1392_v5  ;;  %v49_v62 = vadd.s32 232, %v1392_v5 }
  0x1c   :  { %1276 = vmatprep.subr.msk.bf16.mxu1 %vm1275_vm2, %v1365_v31  ;;  %vm1277_vm5 = vmpackc.low %vm191_vm13, %vm190_vm11  ;;  %vm179_vm13 = vcmp.eq.s32.totalorder %v47_v54, %v1412_v23  ;;  %vm162_vm12 = vcmp.eq.s32.totalorder %v30_v55, %v1412_v23  ;;  %v32_v63 = vadd.s32 96, %v1392_v5  ;;  %v33_v0 = vadd.s32 104, %v1392_v5 }
  0x1d   :  { %1278 = vmatpush3.bf16.msk.msra.mxu1 %vm1277_vm5, %v1365_v31  ;;  %vm1247_vm8 = vmpackc.low %vm177_vm0, %vm176_vm14  ;;  %vm163_vm0 = vcmp.eq.s32.totalorder %v31_v56, %v1412_v23  ;;  %vm210_vm15 = vcmp.eq.s32.totalorder %v78_v57, %v1412_v23  ;;  %v80_v1 = vadd.s32 480, %v1392_v5  ;;  %vm194_vm2 = vcmp.eq.s32.totalorder %v62_v59, %v1412_v23 }
  0x1e   :  { %1248 = vmatprep.subr.msk.bf16.mxu0 %vm1247_vm8, %v1365_v31  ;;  %vm1249_vm11 = vmpackc.low %vm161_vm3, %vm160_vm1  ;;  %vm211_vm1 = vcmp.eq.s32.totalorder %v79_v58, %v1412_v23  ;;  %vm195_vm5 = vcmp.eq.s32.totalorder %v63_v60, %v1412_v23  ;;  %v81_v2 = vadd.s32 488, %v1392_v5  ;;  %v64_v3 = vadd.s32 352, %v1392_v5 }
  0x1f   :  { %1250 = vmatpush3.bf16.msk.msra.mxu0 %vm1249_vm11, %v1365_v31  ;;  %vm1279_vm14 = vmpackc.low %vm209_vm6, %vm208_vm4  ;;  %vm180_vm6 = vcmp.eq.s32.totalorder %v48_v61, %v1412_v23  ;;  %vm181_vm8 = vcmp.eq.s32.totalorder %v49_v62, %v1412_v23  ;;  %v65_v4 = vadd.s32 360, %v1392_v5  ;;  %v50_v6 = vadd.s32 240, %v1392_v5 }
  0x20   :  { %1280 = vmatprep.subr.msk.bf16.mxu1 %vm1279_vm14, %v1365_v31  ;;  %vm1281_vm3 = vmpackc.low %vm193_vm9, %vm192_vm7  ;;  %vm164_vm9 = vcmp.eq.s32.totalorder %v32_v63, %v1412_v23  ;;  %vm165_vm11 = vcmp.eq.s32.totalorder %v33_v0, %v1412_v23  ;;  %v51_v7 = vadd.s32 248, %v1392_v5  ;;  %v34_v8 = vadd.s32 112, %v1392_v5 }
  0x21   :  { %1282 = vmatpush3.bf16.msk.msra.mxu1 %vm1281_vm3, %v1365_v31  ;;  %vm1251_vm4 = vmpackc.low %vm179_vm13, %vm178_vm10  ;;  %vm212_vm13 = vcmp.eq.s32.totalorder %v80_v1, %v1412_v23  ;;  %v35_v9 = vadd.s32 120, %v1392_v5  ;;  %v82_v10 = vadd.s32 496, %v1392_v5  ;;  %v83_v11 = vadd.s32 504, %v1392_v5 }
  0x22   :  { %1252 = vmatprep.subr.msk.bf16.mxu0 %vm1251_vm4, %v1365_v31  ;;  %vm1253_vm7 = vmpackc.low %vm163_vm0, %vm162_vm12  ;;  %vm213_vm14 = vcmp.eq.s32.totalorder %v81_v2, %v1412_v23  ;;  %vm196_vm0 = vcmp.eq.s32.totalorder %v64_v3, %v1412_v23  ;;  %v66_v12 = vadd.s32 368, %v1392_v5  ;;  %v67_v13 = vadd.s32 376, %v1392_v5 }
  0x23   :  { %1254 = vmatpush3.bf16.msk.msra.mxu0 %vm1253_vm7, %v1365_v31  ;;  %vm1283_vm10 = vmpackc.low %vm211_vm1, %vm210_vm15  ;;  %vm197_vm1 = vcmp.eq.s32.totalorder %v65_v4, %v1412_v23  ;;  %vm182_vm3 = vcmp.eq.s32.totalorder %v50_v6, %v1412_v23  ;;  %v100_v14 = vadd.s32 640, %v1392_v5  ;;  %v101_v15 = vadd.s32 648, %v1392_v5 }
  0x24   :  { %1284 = vmatprep.subr.msk.bf16.mxu1 %vm1283_vm10, %v1365_v31  ;;  %vm1285_vm12 = vmpackc.low %vm195_vm5, %vm194_vm2  ;;  %vm183_vm5 = vcmp.eq.s32.totalorder %v51_v7, %v1412_v23  ;;  %vm166_vm4 = vcmp.eq.s32.totalorder %v34_v8, %v1412_v23  ;;  %v84_v16 = vadd.s32 512, %v1392_v5  ;;  %v85_v17 = vadd.s32 520, %v1392_v5 }
  0x25   :  { %1286 = vmatpush3.bf16.msk.msra.mxu1 %vm1285_vm12, %v1365_v31  ;;  %vm1255_vm15 = vmpackc.low %vm181_vm8, %vm180_vm6  ;;  %vm167_vm8 = vcmp.eq.s32.totalorder %v35_v9, %v1412_v23  ;;  %vm214_vm7 = vcmp.eq.s32.totalorder %v82_v10, %v1412_v23  ;;  %v132_v18 = vadd.s32 896, %v1392_v5  ;;  %vm198_vm10 = vcmp.eq.s32.totalorder %v66_v12, %v1412_v23 }
  0x26   :  { %1256 = vmatprep.subr.msk.bf16.mxu0 %vm1255_vm15, %v1365_v31  ;;  %vm1257_vm2 = vmpackc.low %vm165_vm11, %vm164_vm9  ;;  %vm215_vm9 = vcmp.eq.s32.totalorder %v83_v11, %v1412_v23  ;;  %vm199_vm12 = vcmp.eq.s32.totalorder %v67_v13, %v1412_v23  ;;  %v133_v19 = vadd.s32 904, %v1392_v5  ;;  %v116_v20 = vadd.s32 768, %v1392_v5 }
  0x27   :  { %1258 = vmatpush3.bf16.msk.msra.mxu0 %vm1257_vm2, %v1365_v31  ;;  %vm1287_vm6 = vmpackc.low %vm213_vm14, %vm212_vm13  ;;  %vm232_vm14 = vcmp.eq.s32.totalorder %v100_v14, %v1412_v23  ;;  %vm233_vm15 = vcmp.eq.s32.totalorder %v101_v15, %v1412_v23  ;;  %v117_v21 = vadd.s32 776, %v1392_v5  ;;  %v102_v22 = vadd.s32 656, %v1392_v5 }
  0x28   :  { %1288 = vmatprep.subr.msk.bf16.mxu1 %vm1287_vm6, %v1365_v31  ;;  %vm1289_vm11 = vmpackc.low %vm197_vm1, %vm196_vm0  ;;  %vm216_vm1 = vcmp.eq.s32.totalorder %v84_v16, %v1412_v23  ;;  %vm217_vm2 = vcmp.eq.s32.totalorder %v85_v17, %v1412_v23  ;;  %v103_v24 = vadd.s32 664, %v1392_v5  ;;  %v86_v25 = vadd.s32 528, %v1392_v5 }
  0x29   :  { %1290 = vmatpush3.bf16.msk.msra.mxu1 %vm1289_vm11, %v1365_v31  ;;  %vm1259_vm13 = vmpackc.low %vm183_vm5, %vm182_vm3  ;;  %vm264_vm5 = vcmp.eq.s32.totalorder %v132_v18, %v1412_v23  ;;  %v87_v27 = vadd.s32 536, %v1392_v5  ;;  %v134_v28 = vadd.s32 912, %v1392_v5  ;;  %v135_v29 = vadd.s32 920, %v1392_v5 }
  0x2a   :  { %1260 = vmatprep.subr.msk.bf16.mxu0 %vm1259_vm13, %v1365_v31  ;;  %vm1261_vm0 = vmpackc.low %vm167_vm8, %vm166_vm4  ;;  %vm265_vm6 = vcmp.eq.s32.totalorder %v133_v19, %v1412_v23  ;;  %vm248_vm8 = vcmp.eq.s32.totalorder %v116_v20, %v1412_v23  ;;  %v118_v30 = vadd.s32 784, %v1392_v5  ;;  %v119_v32 = vadd.s32 792, %v1392_v5 }
  0x2b   :  { %1262 = vmatpush3.bf16.msk.msra.mxu0 %vm1261_vm0, %v1365_v31  ;;  %vm1291_vm3 = vmpackc.low %vm215_vm9, %vm214_vm7  ;;  %vm249_vm9 = vcmp.eq.s32.totalorder %v117_v21, %v1412_v23  ;;  %vm234_vm11 = vcmp.eq.s32.totalorder %v102_v22, %v1412_v23  ;;  %v104_v35 = vadd.s32 672, %v1392_v5  ;;  %v105_v36 = vadd.s32 680, %v1392_v5  ;;  %v542_v21 = vld [vmem:[%s1971_s1 + $0x30] sm:$0xff] }
  0x2c   :  { %1292 = vmatprep.subr.msk.bf16.mxu1 %vm1291_vm3, %v1365_v31  ;;  %vm1293_vm4 = vmpackc.low %vm199_vm12, %vm198_vm10  ;;  %vm235_vm12 = vcmp.eq.s32.totalorder %v103_v24, %v1412_v23  ;;  %vm218_vm13 = vcmp.eq.s32.totalorder %v86_v25, %v1412_v23  ;;  %v88_v37 = vadd.s32 544, %v1392_v5  ;;  %v89_v38 = vadd.s32 552, %v1392_v5 }
  0x2d   :  { %1294 = vmatpush3.bf16.msk.msra.mxu1 %vm1293_vm4, %v1365_v31  ;;  %vm1295_vm7 = vmpackc.low %vm233_vm15, %vm232_vm14  ;;  %vm219_vm15 = vcmp.eq.s32.totalorder %v87_v27, %v1412_v23  ;;  %vm266_vm0 = vcmp.eq.s32.totalorder %v134_v28, %v1412_v23  ;;  %vm250_vm3 = vcmp.eq.s32.totalorder %v118_v30, %v1412_v23  ;;  %v136_v40 = vadd.s32 928, %v1392_v5 }
  0x2e   :  { %615 = vmatmul.mubr.f32.vlgmr.msra.gmra.mrb[0].mxu0 %v536_v26  ;;  %1296 = vmatprep.subr.msk.bf16.mxu0 %vm1295_vm7, %v1365_v31  ;;  %vm1297_vm10 = vmpackc.low %vm217_vm2, %vm216_vm1  ;;  %vm267_vm1 = vcmp.eq.s32.totalorder %v135_v29, %v1412_v23  ;;  %v137_v41 = vadd.s32 936, %v1392_v5  ;;  %vm237_vm7 = vcmp.eq.s32.totalorder %v105_v36, %v1412_v23  ;;  %v120_v42 = vadd.s32 800, %v1392_v5 }
  0x2f   :  { %1298 = vmatpush3.bf16.msk.msra.mxu0 %vm1297_vm10, %v1365_v31  ;;  %vm1327_vm14 = vmpackc.low %vm265_vm6, %vm264_vm5  ;;  %754 = vmatprep.mubr.f32.mxu0 %v541_v33  ;;  %vm251_vm5 = vcmp.eq.s32.totalorder %v119_v32, %v1412_v23  ;;  %vm236_vm6 = vcmp.eq.s32.totalorder %v104_v35, %v1412_v23  ;;  %v121_v43 = vadd.s32 808, %v1392_v5  ;;  %vm221_vm10 = vcmp.eq.s32.totalorder %v89_v38, %v1412_v23 }
  0x30   :  { %1328 = vmatprep.subr.msk.bf16.mxu1 %vm1327_vm14, %v1365_v31  ;;  %685 = vmatmul.mubr.f32.vlgmr.msra.gmra.mrb[0].mxu1 %v538_v34  ;;  %vm1329_vm2 = vmpackc.low %vm249_vm9, %vm248_vm8  ;;  %vm220_vm9 = vcmp.eq.s32.totalorder %v88_v37, %v1412_v23  ;;  %v106_v44 = vadd.s32 688, %v1392_v5  ;;  %v107_v45 = vadd.s32 696, %v1392_v5  ;;  %v90_v46 = vadd.s32 560, %v1392_v5 }
  0x31   :  { %1330 = vmatpush3.bf16.msk.msra.mxu1 %vm1329_vm2, %v1365_v31  ;;  %vm1299_vm4 = vmpackc.low %vm235_vm12, %vm234_vm11  ;;  %824 = vmatprep.mubr.f32.mxu1 %v543_v39  ;;  %v91_v47 = vadd.s32 568, %v1392_v5  ;;  %v138_v48 = vadd.s32 944, %v1392_v5  ;;  %v139_v49 = vadd.s32 952, %v1392_v5  ;;  %vm269_vm14 = vcmp.eq.s32.totalorder %v137_v41, %v1412_v23 }
  0x32   :  { %1300 = vmatprep.subr.msk.bf16.mxu0 %vm1299_vm4, %v1365_v31  ;;  %vm1301_vm8 = vmpackc.low %vm219_vm15, %vm218_vm13  ;;  %vm268_vm13 = vcmp.eq.s32.totalorder %v136_v40, %v1412_v23  ;;  %v122_v50 = vadd.s32 816, %v1392_v5  ;;  %v123_v51 = vadd.s32 824, %v1392_v5  ;;  %v108_v52 = vadd.s32 704, %v1392_v5 }
  0x33   :  { %1302 = vmatpush3.bf16.msk.msra.mxu0 %vm1301_vm8, %v1365_v31  ;;  %vm1331_vm11 = vmpackc.low %vm267_vm1, %vm266_vm0  ;;  %vm252_vm0 = vcmp.eq.s32.totalorder %v120_v42, %v1412_v23  ;;  %vm253_vm1 = vcmp.eq.s32.totalorder %v121_v43, %v1412_v23  ;;  %v109_v53 = vadd.s32 712, %v1392_v5  ;;  %v92_v54 = vadd.s32 576, %v1392_v5 }
  0x34   :  { %1332 = vmatprep.subr.msk.bf16.mxu1 %vm1331_vm11, %v1365_v31  ;;  %vm1333_vm12 = vmpackc.low %vm251_vm5, %vm250_vm3  ;;  %vm238_vm3 = vcmp.eq.s32.totalorder %v106_v44, %v1412_v23  ;;  %vm239_vm5 = vcmp.eq.s32.totalorder %v107_v45, %v1412_v23  ;;  %v93_v55 = vadd.s32 584, %v1392_v5  ;;  %vm270_vm8 = vcmp.eq.s32.totalorder %v138_v48, %v1412_v23 }
  0x35   :  { %1334 = vmatpush3.bf16.msk.msra.mxu1 %vm1333_vm12, %v1365_v31  ;;  %vm1303_vm15 = vmpackc.low %vm237_vm7, %vm236_vm6  ;;  %vm222_vm6 = vcmp.eq.s32.totalorder %v90_v46, %v1412_v23  ;;  %vm223_vm7 = vcmp.eq.s32.totalorder %v91_v47, %v1412_v23  ;;  %vm254_vm11 = vcmp.eq.s32.totalorder %v122_v50, %v1412_v23  ;;  %vm255_vm12 = vcmp.eq.s32.totalorder %v123_v51, %v1412_v23 }
  0x36   :  { %1304 = vmatprep.subr.msk.bf16.mxu0 %vm1303_vm15, %v1365_v31  ;;  %vm1305_vm2 = vmpackc.low %vm221_vm10, %vm220_vm9  ;;  %vm271_vm9 = vcmp.eq.s32.totalorder %v139_v49, %v1412_v23  ;;  %v140_v56 = vadd.s32 960, %v1392_v5  ;;  %v141_v57 = vadd.s32 968, %v1392_v5  ;;  %vm241_vm15 = vcmp.eq.s32.totalorder %v109_v53, %v1412_v23 }
  0x37   :  { %1306 = vmatpush3.bf16.msk.msra.mxu0 %vm1305_vm2, %v1365_v31  ;;  %vm1335_vm4 = vmpackc.low %vm269_vm14, %vm268_vm13  ;;  %vm240_vm14 = vcmp.eq.s32.totalorder %v108_v52, %v1412_v23  ;;  %v124_v58 = vadd.s32 832, %v1392_v5  ;;  %v125_v59 = vadd.s32 840, %v1392_v5  ;;  %vm225_vm2 = vcmp.eq.s32.totalorder %v93_v55, %v1412_v23 }
  0x38   :  { %1336 = vmatprep.subr.msk.bf16.mxu1 %vm1335_vm4, %v1365_v31  ;;  %vm1337_vm10 = vmpackc.low %vm253_vm1, %vm252_vm0  ;;  %vm224_vm1 = vcmp.eq.s32.totalorder %v92_v54, %v1412_v23  ;;  %v110_v60 = vadd.s32 720, %v1392_v5  ;;  %v111_v61 = vadd.s32 728, %v1392_v5  ;;  %v94_v62 = vadd.s32 592, %v1392_v5 }
  0x39   :  { %1338 = vmatpush3.bf16.msk.msra.mxu1 %vm1337_vm10, %v1365_v31  ;;  %vm1307_vm13 = vmpackc.low %vm239_vm5, %vm238_vm3  ;;  %v95_v63 = vadd.s32 600, %v1392_v5  ;;  %v142_v0 = vadd.s32 976, %v1392_v5  ;;  %v143_v1 = vadd.s32 984, %v1392_v5  ;;  %vm272_vm4 = vcmp.eq.s32.totalorder %v140_v56, %v1412_v23 }
  0x3a   :  { %1308 = vmatprep.subr.msk.bf16.mxu0 %vm1307_vm13, %v1365_v31  ;;  %vm1309_vm0 = vmpackc.low %vm223_vm7, %vm222_vm6  ;;  %vm273_vm6 = vcmp.eq.s32.totalorder %v141_v57, %v1412_v23  ;;  %v126_v2 = vadd.s32 848, %v1392_v5  ;;  %v127_v3 = vadd.s32 856, %v1392_v5  ;;  %v112_v4 = vadd.s32 736, %v1392_v5 }
  0x3b   :  { %1310 = vmatpush3.bf16.msk.msra.mxu0 %vm1309_vm0, %v1365_v31  ;;  %vm1339_vm3 = vmpackc.low %vm271_vm9, %vm270_vm8  ;;  %vm256_vm8 = vcmp.eq.s32.totalorder %v124_v58, %v1412_v23  ;;  %vm257_vm9 = vcmp.eq.s32.totalorder %v125_v59, %v1412_v23  ;;  %v113_v6 = vadd.s32 744, %v1392_v5  ;;  %v96_v7 = vadd.s32 608, %v1392_v5 }
  0x3c   :  { %1340 = vmatprep.subr.msk.bf16.mxu1 %vm1339_vm3, %v1365_v31  ;;  %vm1341_vm5 = vmpackc.low %vm255_vm12, %vm254_vm11  ;;  %vm242_vm11 = vcmp.eq.s32.totalorder %v110_v60, %v1412_v23  ;;  %vm243_vm12 = vcmp.eq.s32.totalorder %v111_v61, %v1412_v23  ;;  %v97_v8 = vadd.s32 616, %v1392_v5  ;;  %vm274_vm0 = vcmp.eq.s32.totalorder %v142_v0, %v1412_v23 }
  0x3d   :  { %1342 = vmatpush3.bf16.msk.msra.mxu1 %vm1341_vm5, %v1365_v31  ;;  %vm1311_vm7 = vmpackc.low %vm241_vm15, %vm240_vm14  ;;  %vm226_vm14 = vcmp.eq.s32.totalorder %v94_v62, %v1412_v23  ;;  %vm227_vm15 = vcmp.eq.s32.totalorder %v95_v63, %v1412_v23  ;;  %vm258_vm3 = vcmp.eq.s32.totalorder %v126_v2, %v1412_v23  ;;  %vm259_vm5 = vcmp.eq.s32.totalorder %v127_v3, %v1412_v23 }
  0x3e   :  { %1312 = vmatprep.subr.msk.bf16.mxu0 %vm1311_vm7, %v1365_v31  ;;  %vm1313_vm10 = vmpackc.low %vm225_vm2, %vm224_vm1  ;;  %vm275_vm1 = vcmp.eq.s32.totalorder %v143_v1, %v1412_v23  ;;  %v144_v9 = vadd.s32 992, %v1392_v5  ;;  %v145_v10 = vadd.s32 1000, %v1392_v5  ;;  %vm245_vm7 = vcmp.eq.s32.totalorder %v113_v6, %v1412_v23 }
  0x3f   :  { %1314 = vmatpush3.bf16.msk.msra.mxu0 %vm1313_vm10, %v1365_v31  ;;  %vm1343_vm13 = vmpackc.low %vm273_vm6, %vm272_vm4  ;;  %vm244_vm6 = vcmp.eq.s32.totalorder %v112_v4, %v1412_v23  ;;  %v128_v11 = vadd.s32 864, %v1392_v5  ;;  %v129_v12 = vadd.s32 872, %v1392_v5  ;;  %vm229_vm10 = vcmp.eq.s32.totalorder %v97_v8, %v1412_v23 }
  0x40   :  { %1344 = vmatprep.subr.msk.bf16.mxu1 %vm1343_vm13, %v1365_v31  ;;  %vm1345_vm2 = vmpackc.low %vm257_vm9, %vm256_vm8  ;;  %vm228_vm9 = vcmp.eq.s32.totalorder %v96_v7, %v1412_v23  ;;  %v114_v13 = vadd.s32 752, %v1392_v5  ;;  %v115_v14 = vadd.s32 760, %v1392_v5  ;;  %v98_v15 = vadd.s32 624, %v1392_v5 }
  0x41   :  { %1346 = vmatpush3.bf16.msk.msra.mxu1 %vm1345_vm2, %v1365_v31  ;;  %vm1315_vm4 = vmpackc.low %vm243_vm12, %vm242_vm11  ;;  %v99_v16 = vadd.s32 632, %v1392_v5  ;;  %v130_v17 = vadd.s32 880, %v1392_v5  ;;  %v131_v18 = vadd.s32 888, %v1392_v5  ;;  %vm276_vm13 = vcmp.eq.s32.totalorder %v144_v9, %v1412_v23 }
  0x42   :  { %1316 = vmatprep.subr.msk.bf16.mxu0 %vm1315_vm4, %v1365_v31  ;;  %vm1317_vm8 = vmpackc.low %vm227_vm15, %vm226_vm14  ;;  %vm277_vm14 = vcmp.eq.s32.totalorder %v145_v10, %v1412_v23  ;;  %v146_v19 = vadd.s32 1008, %v1392_v5  ;;  %v147_v20 = vadd.s32 1016, %v1392_v5  ;;  %vm246_vm4 = vcmp.eq.s32.totalorder %v114_v13, %v1412_v23  ;;  %v540_v5 = vld [vmem:[%s1971_s1 + $0x20] sm:$0xff] }
  0x43   :  { %1318 = vmatpush3.bf16.msk.msra.mxu0 %vm1317_vm8, %v1365_v31  ;;  %vm1347_vm11 = vmpackc.low %vm275_vm1, %vm274_vm0  ;;  %vm260_vm0 = vcmp.eq.s32.totalorder %v128_v11, %v1412_v23  ;;  %vm261_vm1 = vcmp.eq.s32.totalorder %v129_v12, %v1412_v23  ;;  %vm262_vm2 = vcmp.eq.s32.totalorder %v130_v17, %v1412_v23  ;;  %vm247_vm8 = vcmp.eq.s32.totalorder %v115_v14, %v1412_v23 }
  0x44   :  { %1348 = vmatprep.subr.msk.bf16.mxu1 %vm1347_vm11, %v1365_v31  ;;  %vm1349_vm12 = vmpackc.low %vm259_vm5, %vm258_vm3  ;;  %vm263_vm3 = vcmp.eq.s32.totalorder %v131_v18, %v1412_v23  ;;  %vm231_vm11 = vcmp.eq.s32.totalorder %v99_v16, %v1412_v23 }
  0x45   :  { %1350 = vmatpush3.bf16.msk.msra.mxu1 %vm1349_vm12, %v1365_v31  ;;  %vm1319_vm15 = vmpackc.low %vm245_vm7, %vm244_vm6  ;;  %vm230_vm7 = vcmp.eq.s32.totalorder %v98_v15, %v1412_v23 }
  0x46   :  { %1320 = vmatprep.subr.msk.bf16.mxu0 %vm1319_vm15, %v1365_v31  ;;  %vm1321_vm5 = vmpackc.low %vm229_vm10, %vm228_vm9  ;;  %vm278_vm15 = vcmp.eq.s32.totalorder %v146_v19, %v1412_v23  ;;  %vm279_vm9 = vcmp.eq.s32.totalorder %v147_v20, %v1412_v23 }
  0x47   :  { %1322 = vmatpush3.bf16.msk.msra.mxu0 %vm1321_vm5, %v1365_v31  ;;  %vm1351_vm6 = vmpackc.low %vm277_vm14, %vm276_vm13 }
  0x48   :  { %1352 = vmatprep.subr.msk.bf16.mxu1 %vm1351_vm6, %v1365_v31  ;;  %vm1353_vm12 = vmpackc.low %vm261_vm1, %vm260_vm0 }
  0x49   :  { %1354 = vmatpush3.bf16.msk.msra.mxu1 %vm1353_vm12, %v1365_v31  ;;  %vm1323_vm10 = vmpackc.low %vm247_vm8, %vm246_vm4 }
  0x4a   :  { %1324 = vmatprep.subr.msk.bf16.mxu0 %vm1323_vm10, %v1365_v31  ;;  %vm1325_vm5 = vmpackc.low %vm231_vm11, %vm230_vm7 }
  0x4b   :  { %1326 = vmatpush3.bf16.msk.msra.mxu0 %vm1325_vm5, %v1365_v31  ;;  %vm1355_vm13 = vmpackc.low %vm279_vm9, %vm278_vm15 }
  0x4c   :  { %1356 = vmatprep.subr.msk.bf16.mxu1 %vm1355_vm13, %v1365_v31  ;;  %vm1357_vm14 = vmpackc.low %vm263_vm3, %vm262_vm2 }
  0x4d   :  { %1358 = vmatpush3.bf16.msk.msra.mxu1 %vm1357_vm14, %v1365_v31 }
  0x4e   :  { %755 = vmatmul.mubr.f32.vlgmr.msra.gmra.mrb[2].mxu0 %v540_v5 }
  0x50   :  { %825 = vmatmul.mubr.f32.vlgmr.msra.gmra.mrb[2].mxu1 %v542_v21 }
  0x82   :  { %v548_v25 = vpop.permute.xlu0 %547 }
 0x101   :  { %v1123_v22 = vpop.f32.mrb[0].mxu0 }
 0x102   :  { %v1124_v24 = vpop.f32.mrb[1].mxu0 }
 0x103   :  { %v1125_v26 = vadd.f32 %v1124_v24, %v1123_v22  ;;  %v1158_v27 = vpop.f32.mrb[0].mxu1 }
 0x104   :  { %v1159_v28 = vpop.f32.mrb[1].mxu1 }
 0x105   :  { %v617_v29 = vadd.f32 %v1125_v26, %v548_v25  ;;  %v1160_v30 = vadd.f32 %v1159_v28, %v1158_v27 }
 0x107   :  { %v687_v32 = vadd.f32 %v1160_v30, %v617_v29 }
 0x121   :  { %v1193_v33 = vpop.f32.mrb[2].mxu0 }
 0x122   :  { %v1194_v23 = vpop.f32.mrb[3].mxu0 }
 0x123   :  { %v1195_v34 = vadd.f32 %v1194_v23, %v1193_v33  ;;  %v1228_v35 = vpop.f32.mrb[2].mxu1 }
 0x124   :  { %v1229_v31 = vpop.f32.mrb[3].mxu1 }
 0x125   :  { %v757_v36 = vadd.f32 %v1195_v34, %v687_v32  ;;  %v1230_v37 = vadd.f32 %v1229_v31, %v1228_v35 }
 0x127   :  { %v827_v38 = vadd.f32 %v1230_v37, %v757_v36 }
 0x129   :  { %830 = vst [vmem:[%s1973_s3] sm:$0xff] %v827_v38 }

</bundles_post_ra>
